<compile_context>
chip_gen: v7x
topology: tpu7x:2x2x1
jax: 0.10.0
libtpu: 0.0.40
codegen_flags: <defaults>
</compile_context>

<pallas_src>
import jax
import jax.numpy as jnp
from jax import lax
from jax.experimental import pallas as pl
from jax.experimental.pallas import tpu as pltpu


def _attention_head_kernel(x_ref, w_ref, o_ref):
    # x_ref: (1, T, C) f32   w_ref: (3, C, H) bf16 (Q columns pre-scaled)
    # o_ref: (1, T, H) f32
    x = x_ref[0].astype(jnp.bfloat16)                       # (T, C) bf16 (in-kernel cast)

    # --- Q/K/V projections: leading-axis weight slices, no lane slicing ----
    q = jnp.dot(x, w_ref[0], preferred_element_type=jnp.float32)   # (T, H), scale folded in
    k = jnp.dot(x, w_ref[1], preferred_element_type=jnp.float32)
    v = jnp.dot(x, w_ref[2], preferred_element_type=jnp.float32)

    # --- Scores: q @ k^T via trailing-dim contraction (no transpose) -------
    s = jnp.einsum('qh,kh->qk',
                   q.astype(jnp.bfloat16), k.astype(jnp.bfloat16),
                   preferred_element_type=jnp.float32)              # (T, T) f32

    # --- Causal mask from a single (T, T) iota pair -------------------------
    T = s.shape[0]
    row = lax.broadcasted_iota(jnp.int32, (T, T), 0)
    col = lax.broadcasted_iota(jnp.int32, (T, T), 1)
    s = jnp.where(col <= row, s, jnp.float32(-1e30))   # finite bias: NaN-proof in f32

    # --- Numerically stable softmax in f32 ----------------------------------
    m = jnp.max(s, axis=-1, keepdims=True)
    e = jnp.exp(s - m)
    denom = jnp.sum(e, axis=-1, keepdims=True)
    p = e * pl.reciprocal(denom, approx=True)

    # TODO(synk): nn.Dropout(attn_dropout) is identity in eval mode; training-
    # mode stochastic dropout on `p` is intentionally not applied here.

    # --- Weighted values -----------------------------------------------------
    out = jnp.dot(p.astype(jnp.bfloat16), v.astype(jnp.bfloat16),
                  preferred_element_type=jnp.float32)               # (T, H) f32
    o_ref[0, :, :] = out.astype(o_ref.dtype)


def single_attention_head(x, wq, wk, wv):
    """x: (B, T, C) f32; wq/wk/wv: (H, C) f32 (nn.Linear layout) -> (B, T, H) f32."""
    B, T, C = x.shape
    H = wq.shape[0]
    scale = jnp.float32(H) ** -0.5

    # Per-weight (not per-call) layout plumbing: fold softmax scale into the Q
    # weight, pre-transpose, stack as (3, C, H) so q/k/v are free leading-axis
    # slices inside the kernel (no lane-dim slicing / relayout).
    w_stack = jnp.stack([(wq * scale).T, wk.T, wv.T], axis=0).astype(jnp.bfloat16)

    return pl.pallas_call(
        _attention_head_kernel,
        out_shape=jax.ShapeDtypeStruct((B, T, H), x.dtype),
        grid=(B,),
        in_specs=[
            pl.BlockSpec((1, T, C), lambda b: (b, 0, 0)),
            pl.BlockSpec((3, C, H), lambda b: (0, 0, 0)),   # resident across steps
        ],
        out_specs=pl.BlockSpec((1, T, H), lambda b: (b, 0, 0)),
        compiler_params=pltpu.CompilerParams(
            dimension_semantics=("parallel",),              # v7x: both TensorCores
            vmem_limit_bytes=32 * 1024 * 1024),             # v5e default scope is 16 MiB
    )(x, w_stack)


def _reference(x, wq, wk, wv):
    """Plain-JAX f32 reference matching the PyTorch forward (eval mode)."""
    q = x @ wq.T
    k = x @ wk.T
    v = x @ wv.T
    H = wq.shape[0]
    wei = (q @ jnp.swapaxes(k, -2, -1)) * (H ** -0.5)
    T = x.shape[1]
    mask = jnp.tril(jnp.ones((T, T), dtype=bool))
    wei = jnp.where(mask, wei, -jnp.inf)
    wei = jax.nn.softmax(wei, axis=-1)
    return wei @ v


if __name__ == "__main__":
    # Config(emb_size=32, head_nb=4, block_size=8) -> head_size = 32 // 4 = 8
    B, T, C = 2, 8, 32
    head_nb = 4
    H = C // head_nb

    key = jax.random.PRNGKey(0)
    kx, kq, kk, kv = jax.random.split(key, 4)

    x = jax.random.normal(kx, (B, T, C), dtype=jnp.float32)

    # Deterministic nn.Linear-style init: U(-1/sqrt(C), 1/sqrt(C)), shape (H, C).
    bound = 1.0 / (C ** 0.5)
    wq = jax.random.uniform(kq, (H, C), jnp.float32, -bound, bound)
    wk = jax.random.uniform(kk, (H, C), jnp.float32, -bound, bound)
    wv = jax.random.uniform(kv, (H, C), jnp.float32, -bound, bound)

    out = single_attention_head(x, wq, wk, wv)
    out = jax.block_until_ready(out)

    ref = _reference(x, wq, wk, wv)
    assert out.shape == (B, T, H)
    # bf16 MXU operands + approx reciprocal -> relaxed (but tight-for-bf16) tol.
    assert jnp.allclose(out, ref, atol=2e-2, rtol=2e-2), (
        float(jnp.max(jnp.abs(out - ref))))

    print("KERNEL_OK")
</pallas_src>

<mosaic_0001>
module attributes {stable_mosaic.version = 11 : i64} {
  func.func @_attention_head_kernel(%arg0: i32, %arg1: memref<1x8x32xf32, #tpu.memory_space<vmem>>, %arg2: memref<3x32x8xbf16, #tpu.memory_space<vmem>>, %arg3: memref<1x8x8xf32, #tpu.memory_space<vmem>>) attributes {dimension_semantics = [#tpu.dimension_semantics<parallel>], iteration_bounds = array<i64: 2>, scalar_prefetch = 0 : i64, scratch_operands = 0 : i64, tpu.core_type = #tpu.core_type<tc>, window_params = [{transform_indices = @transform_0, window_bounds = array<i64: 1, 8, 32>}, {pipeline_mode = #tpu.pipeline_mode<synchronous>, transform_indices = @transform_1, window_bounds = array<i64: 3, 32, 8>}, {transform_indices = @transform_2, window_bounds = array<i64: 1, 8, 8>}]} {
    %c0 = arith.constant 0 : index
    %c0_0 = arith.constant 0 : index
    %c0_1 = arith.constant 0 : index
    %0 = vector.load %arg1[%c0, %c0_0, %c0_1] : memref<1x8x32xf32, #tpu.memory_space<vmem>>, vector<1x8x32xf32>
    %1 = vector.shape_cast %0 : vector<1x8x32xf32> to vector<8x32xf32>
    %2 = arith.truncf %1 : vector<8x32xf32> to vector<8x32xbf16>
    %c0_2 = arith.constant 0 : index
    %c0_3 = arith.constant 0 : index
    %c0_4 = arith.constant 0 : index
    %3 = vector.load %arg2[%c0_2, %c0_3, %c0_4] : memref<3x32x8xbf16, #tpu.memory_space<vmem>>, vector<1x32x8xbf16>
    %4 = vector.shape_cast %3 : vector<1x32x8xbf16> to vector<32x8xbf16>
    %cst = arith.constant dense<0.000000e+00> : vector<8x8xf32>
    %5 = tpu.matmul %2, %4, %cst {dimension_numbers = #tpu.dot_dimension_numbers<[1], [0], [0], [1], [0, 0, 1, 1], [], []>} : vector<8x32xbf16>, vector<32x8xbf16>, vector<8x8xf32> -> vector<8x8xf32>
    %c1 = arith.constant 1 : index
    %c0_5 = arith.constant 0 : index
    %c0_6 = arith.constant 0 : index
    %6 = vector.load %arg2[%c1, %c0_5, %c0_6] : memref<3x32x8xbf16, #tpu.memory_space<vmem>>, vector<1x32x8xbf16>
    %7 = vector.shape_cast %6 : vector<1x32x8xbf16> to vector<32x8xbf16>
    %cst_7 = arith.constant dense<0.000000e+00> : vector<8x8xf32>
    %8 = tpu.matmul %2, %7, %cst_7 {dimension_numbers = #tpu.dot_dimension_numbers<[1], [0], [0], [1], [0, 0, 1, 1], [], []>} : vector<8x32xbf16>, vector<32x8xbf16>, vector<8x8xf32> -> vector<8x8xf32>
    %c2 = arith.constant 2 : index
    %c0_8 = arith.constant 0 : index
    %c0_9 = arith.constant 0 : index
    %9 = vector.load %arg2[%c2, %c0_8, %c0_9] : memref<3x32x8xbf16, #tpu.memory_space<vmem>>, vector<1x32x8xbf16>
    %10 = vector.shape_cast %9 : vector<1x32x8xbf16> to vector<32x8xbf16>
    %cst_10 = arith.constant dense<0.000000e+00> : vector<8x8xf32>
    %11 = tpu.matmul %2, %10, %cst_10 {dimension_numbers = #tpu.dot_dimension_numbers<[1], [0], [0], [1], [0, 0, 1, 1], [], []>} : vector<8x32xbf16>, vector<32x8xbf16>, vector<8x8xf32> -> vector<8x8xf32>
    %12 = arith.truncf %5 : vector<8x8xf32> to vector<8x8xbf16>
    %13 = arith.truncf %8 : vector<8x8xf32> to vector<8x8xbf16>
    "tpu.trace_start"() <{level = 10 : i32, message = "qh,kh->qk"}> : () -> ()
    %cst_11 = arith.constant dense<0.000000e+00> : vector<8x8xf32>
    %14 = tpu.matmul %12, %13, %cst_11 {dimension_numbers = #tpu.dot_dimension_numbers<[1], [1], [0], [0], [0, 0, 1, 0], [], []>} : vector<8x8xbf16>, vector<8x8xbf16>, vector<8x8xf32> -> vector<8x8xf32>
    "tpu.trace_stop"() : () -> ()
    %15 = tpu.iota {dimensions = array<i32: 0>} : vector<8x8xi32>
    %16 = tpu.iota {dimensions = array<i32: 1>} : vector<8x8xi32>
    %17 = arith.cmpi sle, %16, %15 : vector<8x8xi32>
    %cst_12 = arith.constant -1.000000e+30 : f32
    %18 = vector.broadcast %cst_12 : f32 to vector<8x8xf32>
    %19 = arith.select %17, %14, %18 : vector<8x8xi1>, vector<8x8xf32>
    %cst_13 = arith.constant dense<0xFF800000> : vector<8xf32>
    %20 = vector.multi_reduction <maximumf>, %19, %cst_13 [1] : vector<8x8xf32> to vector<8xf32>
    %21 = vector.shape_cast %20 : vector<8xf32> to vector<8x1xf32>
    %22 = vector.broadcast %21 : vector<8x1xf32> to vector<8x8xf32>
    %23 = arith.subf %19, %22 : vector<8x8xf32>
    %24 = math.exp %23 : vector<8x8xf32>
    %cst_14 = arith.constant dense<0.000000e+00> : vector<8xf32>
    %25 = vector.multi_reduction <add>, %24, %cst_14 [1] : vector<8x8xf32> to vector<8xf32>
    %26 = vector.shape_cast %25 : vector<8xf32> to vector<8x1xf32>
    %27 = tpu.reciprocal %26 {approx = true} : vector<8x1xf32> -> vector<8x1xf32>
    %28 = vector.broadcast %27 : vector<8x1xf32> to vector<8x8xf32>
    %29 = arith.mulf %24, %28 : vector<8x8xf32>
    %30 = arith.truncf %29 : vector<8x8xf32> to vector<8x8xbf16>
    %31 = arith.truncf %11 : vector<8x8xf32> to vector<8x8xbf16>
    %cst_15 = arith.constant dense<0.000000e+00> : vector<8x8xf32>
    %32 = tpu.matmul %30, %31, %cst_15 {dimension_numbers = #tpu.dot_dimension_numbers<[1], [0], [0], [1], [0, 0, 1, 1], [], []>} : vector<8x8xbf16>, vector<8x8xbf16>, vector<8x8xf32> -> vector<8x8xf32>
    %c0_16 = arith.constant 0 : index
    %c0_17 = arith.constant 0 : index
    %c0_18 = arith.constant 0 : index
    %33 = vector.load %arg3[%c0_16, %c0_17, %c0_18] : memref<1x8x8xf32, #tpu.memory_space<vmem>>, vector<1x8x8xf32>
    %34 = vector.shape_cast %33 : vector<1x8x8xf32> to vector<8x8xf32>
    %35 = vector.shape_cast %32 : vector<8x8xf32> to vector<1x8x8xf32>
    tpu.vector_store %arg3[%c0_16, %c0_17, %c0_18], %35 {strides = array<i32>} : memref<1x8x8xf32, #tpu.memory_space<vmem>>, vector<1x8x8xf32>,
    return
  }
  func.func @transform_0(%arg0: i32) -> (i32, i32, i32) {
    %c0_i32 = arith.constant 0 : i32
    %c0_i32_0 = arith.constant 0 : i32
    %c0_i32_1 = arith.constant 0 : i32
    return %arg0, %c0_i32, %c0_i32_0 : i32, i32, i32
  }
  func.func @transform_1(%arg0: i32) -> (i32, i32, i32) {
    %c0_i32 = arith.constant 0 : i32
    %c0_i32_0 = arith.constant 0 : i32
    %c0_i32_1 = arith.constant 0 : i32
    %c0_i32_2 = arith.constant 0 : i32
    return %c0_i32, %c0_i32_0, %c0_i32_1 : i32, i32, i32
  }
  func.func @transform_2(%arg0: i32) -> (i32, i32, i32) {
    %c0_i32 = arith.constant 0 : i32
    %c0_i32_0 = arith.constant 0 : i32
    %c0_i32_1 = arith.constant 0 : i32
    return %arg0, %c0_i32, %c0_i32_0 : i32, i32, i32
  }
}

</mosaic_0001>

<bundles_post_ra>
// kernel: tpu_custom_call.1
= control target key start
LH: loop header
LB: loop body
LE: loop exit
PB: predicated region body
PF: predicated region fallthrough
CT: control target
= control target key end

     0   :  { %7 = vsyncpa [#allocation3], 0  ;;  %s848_s0 = inlined_call_operand.vmem [shape: f32[2,8,32], index: 0, kind: input, shape index: {}]   ;;  %s849_s1 = inlined_call_operand.vmem [shape: bf16[3,32,8], index: 1, kind: input, shape index: {}]   ;;  %s850_s2 = inlined_call_operand.hbm [shape: f32[2,8,8], index: 2, kind: output, shape index: {}]  }
   0x1   :  { %9 = vsyncpa [#allocation3 + $0x1], 0  ;;  %s716_s9 = smov 0   ;;  %s718_s10 = smov 0  }
   0x2   :  { %s720_s11 = smov 0   ;;  %s722_s12 = smov 0  }
   0x3 LB: > { %s737_s13 = sadd.s32 4294967295, %s696_s12   ;;  %s505_s14 = sadd.s32 4294967294, %s696_s12   ;;  %s696_s12 = sphi %s722_s12, %s856_s12   ;;  %s692_s11 = sphi %s720_s11, %s855_s11   ;;  %s688_s10 = sphi %s718_s10, %s854_s10   ;;  %s684_s9 = sphi %s716_s9, %s853_s9  }
   0x4   : > { %s741_s15 = sadd.s32 1, %s696_s12   ;;  %s69_s16 = sadd.s32 1, %s692_s11 }
   0x5   : > { %s66_s17 = ssub.s32 %s696_s12, %s741_s15  ;;  %p79_p0 = scmp.ne.s32.totalorder %s692_s11, %s688_s10 }
   0x6   : > { %p67_p1 = scmp.eq.s32.totalorder %s66_s17, 0  ;;  %p80_p2 = scmp.eq.s32.totalorder %s737_s13, 1 }
   0x7   : > { %p85_p3 = scmp.ne.s32.totalorder %s688_s10, %s684_s9  ;;  %p86_p4 = scmp.eq.s32.totalorder %s505_s14, 1 }
   0x8   : > { %s752_s18 = scalar_select %p67_p1, %s692_s11, %s69_s16  }
   0x9   : > { %p754_p5 = por %p80_p2, %p79_p0  ;;  %p758_p6 = por %p86_p4, %p85_p3 }
   0xa   : > { %p508_p7 = scmp.ge.s32.totalorder %s696_s12, 1  ;;  %p114_p8 = scmp.lt.s32.totalorder %s696_s12, 3 }
   0xc   : > { %p115_p9 = pnand %p508_p7, %p114_p8 }
   0xd   : > { %v624_v0 = vld [vmem:[%s849_s1 + $0x10] sm:$0xff] (!%p115_p9)   ;;  %v698_v1 = vmov (!%p115_p9), 0.0   ;;  %v625_v2 = vld [vmem:[%s849_s1 + $0x18] sm:$0xff] (!%p115_p9)   ;;  %v626_v3 = vld [vmem:[%s849_s1] sm:$0xff] (!%p115_p9)   ;;  %vm699_vm0 = vmmov (!%p115_p9), 0   ;;  %p135_p10 = scmp.lt.s32.totalorder (!%p115_p9), %s737_s13, 1  ;;  %v365_v20 = vlaneseq (!%p115_p9) }
   0xe   : > { %118 = sbr.rel (%p115_p9) target bundleno = 1006 (0x3ee), region = 28  ;;  %555 = vmatprep.subr.bf16.mxu1 (!%p115_p9), %v698_v1  ;;  %547 = vmatprep.subr.bf16.mxu0 (!%p115_p9), %v698_v1  ;;  %v627_v4 = vld [vmem:[%s849_s1 + $0x8] sm:$0xff] (!%p115_p9)   ;;  %vm158_vm1 = vcmask (!%p115_p9), 261120   ;;  %vm318_vm2 = vcmask (!%p115_p9), 64512   ;;  %v628_v18 = vld [vmem:[%s849_s1 + $0x20] sm:$0xff] (!%p115_p9)   ;;  %vm387_vm4 = vcmask (!%p115_p9), 1043456  }
   0xf   : > { %556 = vmatpush3.bf16.msra.mxu1 (!%p115_p9), %v624_v0  ;;  %559 = vmatprep.mubr.msk.bf16.mxu1 (!%p115_p9), %vm699_vm0, %v698_v1  ;;  %v629_v19 = vld [vmem:[%s849_s1 + $0x28] sm:$0xff] (!%p115_p9)   ;;  %v366_v21 = vshrl.u32 (!%p115_p9), %v365_v20, 7  ;;  %v368_v22 = vand.u32 (!%p115_p9), 127, %v365_v20  ;;  %s132_s16 = sand.u32 (!%p115_p9), 1, %s688_s10   ;;  %s531_s21 = sshll.u32 (!%p115_p9), %s737_s13, 7 }
  0x10   : > { %557 = vmatprep.subr.bf16.mxu1 (!%p115_p9), %v698_v1  ;;  %551 = vmatprep.mubr.msk.bf16.mxu0 (!%p115_p9), %vm699_vm0, %v698_v1  ;;  %s509_s17 = sshll.u32 (!%p115_p9), %s132_s16, 3  ;;  %s805_s26 = scalar_lea.hbm (!%p115_p9), %s850_s2, %s531_s21 }
  0x11   : > { %548 = vmatpush3.bf16.msra.mxu0 (!%p115_p9), %v626_v3  ;;  %vm369_vm3 = vcmp.le.s32.totalorder (!%p115_p9), %v368_v22, %v366_v21  ;;  %s134_s22 = scalar_lea.vmem (!%p115_p9), [#allocation2], %s509_s17 }
  0x12   : > { %549 = vmatprep.subr.bf16.mxu0 (!%p115_p9), %v698_v1  ;;  %s446_s23 = sshll.u32 (!%p115_p9), %s134_s22, 4  ;;  %s807_s23 = int_to_ptr.vmem [resolvable:$true] %s446_s23 }
  0x13   : > { %558 = vmatpush3.bf16.msra.mxu1 (!%p115_p9), %v625_v2  ;;  %s634_s28 = scalar_lea.vmem (!%p115_p9), %s807_s23, 128 }
  0x14   : > { %571 = vmatprep.subr.bf16.mxu1 (!%p115_p9), %v698_v1  ;;  %p635_p11 = scmp.ne.s32.totalorder (!%p115_p9), %s807_s23, %s634_s28 }
  0x15   : > { %s136_s27 = scalar_select %p135_p10, %s737_s13, 1  ;;  %550 = vmatpush3.bf16.msra.mxu0 %v627_v4 }
  0x16   : > { %563 = vmatprep.subr.bf16.mxu0 %v698_v1  ;;  %p636_p12 = pnand %p635_p11, %p754_p5  ;;  %s700_s13 = smov [#allocation2]  }
  0x17   : > { %s510_s30 = sshll.u32 %s136_s27, 3  ;;  %s433_s27 = scalar_lea.sflag [#allocation3], %s132_s16 }
  0x18   : > { %s138_s5 = scalar_lea.vmem %s848_s0, %s510_s30  ;;  %p637_p13 = pneg %p636_p12 }
  0x19   : > { %v140_v5 = vld [vmem:[%s138_s5] sm:$0xff]  ;;  %s638_s29 = sshll.u32 %s700_s13, 4  ;;  %s639_s29 = int_to_ptr.vmem [resolvable:$false] %s638_s29 }
  0x1a   : > { %v141_v6 = vpack.c.bf16 %v140_v5, %v140_v5  ;;  %s640_s30 = scalar_lea.vmem %s639_s29, 256  ;;  %p641_p0 = scmp.lt.s32.totalorder %s807_s23, %s639_s29 }
  0x1b   : > { %p642_p1 = scmp.lt.s32.totalorder %s640_s30, %s634_s28 }
  0x1c   : > { %560 = vmatmul.mubr.msk.bf16.vlgmr.msra.gmra.mrb[0].mxu1 %vm158_vm1, %v141_v6  ;;  %552 = vmatmul.mubr.msk.bf16.vlgmr.msra.gmra.mrb[0].mxu0 %vm158_vm1, %v141_v6 }
  0x1d   : > { %573 = vmatprep.mubr.msk.bf16.mxu1 %vm699_vm0, %v698_v1  ;;  %567 = vmatprep.mubr.msk.bf16.mxu0 %vm699_vm0, %v698_v1  ;;  %p643_p2 = por %p642_p1, %p641_p0 }
  0x1e   : > { %564 = vmatpush3.bf16.msra.mxu0 %v628_v18 }
  0x1f   : > { %565 = vmatprep.subr.bf16.mxu0 %v698_v1  ;;  %p644_p3 = pnand %p643_p2, %p637_p13 }
  0x22   : > { %566 = vmatpush3.bf16.msra.mxu0 %v629_v19 }
  0x23   : > { %577 = vmatprep.subr.bf16.mxu0 %v698_v1 }
  0x25   : > { %568 = vmatmul.mubr.msk.bf16.vlgmr.msra.gmra.mrb[4].mxu0 %vm158_vm1, %v141_v6 }
  0x26   : > { %579 = vmatprep.mubr.msk.bf16.mxu0 %vm699_vm0, %v698_v1 }
  0xef   : > { %v253_v7 = vpop.f32.mrb[0].mxu1  ;;  %v196_v8 = vpop.f32.mrb[0].mxu0 }
  0xf0   : > { %v317_v9 = vpack.c.bf16 %v253_v7, %v253_v7  ;;  %v561_v10 = vpop.f32.mrb[1].mxu1  ;;  %v553_v11 = vpop.f32.mrb[1].mxu0  ;;  %v316_v17 = vpack.c.bf16 %v196_v8, %v196_v8 }
  0xf1   : > { %v256_v12 = vpop.f32.mrb[2].mxu1  ;;  %v199_v13 = vpop.f32.mrb[2].mxu0 }
  0xf2   : > { %v323_v14 = vsel %vm318_vm2, %v317_v9, 0  ;;  %v562_v15 = vpop.f32.mrb[3].mxu1  ;;  %v554_v16 = vpop.f32.mrb[3].mxu0 }
  0xf3   : > { %572 = vmatpush3.bf16.xpose.msra.mxu1 %v323_v14 }
  0xf8   : > { %v310_v34 = vpop.f32.mrb[4].mxu0 }
  0xf9   : > { %v569_v35 = vpop.f32.mrb[5].mxu0  ;;  %v383_v38 = vpack.c.bf16 %v310_v34, %v310_v34 }
  0xfa   : > { %574 = vmatmul.mubr.msk.bf16.vlgmr.msra.gmra.mrb[4].mxu1 %vm318_vm2, %v316_v17  ;;  %v313_v36 = vpop.f32.mrb[6].mxu0 }
  0xfb   : > { %v570_v37 = vpop.f32.mrb[7].mxu0  ;;  %v389_v39 = vsel %vm387_vm4, %v383_v38, 0 }
  0xfc   : > { %578 = vmatpush3.bf16.msra.mxu0 %v389_v39 }
 0x1cd   : > { %v359_v23 = vpop.f32.mrb[4].mxu1 }
 0x1ce   : > { %v370_v24 = vsel %vm369_vm3, %v359_v23, -1e+30  ;;  %v575_v25 = vpop.f32.mrb[5].mxu1 }
 0x1cf   : > { %v362_v26 = vpop.f32.mrb[6].mxu1  ;;  %v371_v27 = vsel %vm318_vm2, %v370_v24, -inf }
 0x1d0   : > { %372 = vmax.xlane.f32.xlu0 %v371_v27  ;;  %v576_v28 = vpop.f32.mrb[7].mxu1 }
 0x25d   : > { %v373_v29 = vpop.xlane.xlu0 %372 }
 0x25e   : > { %v374_v30 = vsub.f32 %v370_v24, %v373_v29 }
 0x260   : > { %v375_v31 = vmul.f32 1.442695, %v374_v30 }
 0x262   : > { %630 = vpow2.f32 %v375_v31 }
 0x26c   : > { %v631_v32 = vpop.eup %630 }
 0x26d   : > { %v377_v33 = vsel %vm318_vm2, %v631_v32, 0.0 }
 0x26e   : > { %378 = vadd.xlane.f32.xlu0 %v377_v33 }
 0x2fb   : > { %v379_v40 = vpop.xlane.xlu0 %378 }
 0x2fc   : > { %632 = vrcp.f32 %v379_v40 }
 0x306   : > { %v633_v41 = vpop.eup %632 }
 0x307   : > { %v381_v42 = vmul.f32 %v633_v41, %v631_v32 }
 0x309   : > { %v382_v43 = vpack.c.bf16 %v381_v42, %v381_v42 }
 0x30b   : > { %580 = vmatmul.mubr.msk.bf16.vlgmr.msra.gmra.mrb[8].mxu0 %vm318_vm2, %v382_v43 }
 0x3de   : > { %v425_v44 = vpop.f32.mrb[8].mxu0 }
 0x3df   : > { %431 = vst.msk [vmem:[%s134_s22] sm:$0xff] %vm318_vm2, %v425_v44  ;;  %v581_v45 = vpop.f32.mrb[9].mxu0 }
 0x3e0   : > { %v428_v46 = vpop.f32.mrb[10].mxu0 }
 0x3e1   : > { %647 = shalt.err (!%p644_p3)
}
 0x3e2   : > { %s648_s3 = scalar_lea.hbm %s805_s26, 128  ;;  %s652_s6 = scalar_lea.hbm %s850_s2, 256 }
 0x3e3   : > { %p649_p4 = scmp.ne.s32.totalorder %s805_s26, %s648_s3  ;;  %p653_p9 = scmp.lt.u32.totalorder %s805_s26, %s850_s2 }
 0x3e4   : > { %p654_p10 = scmp.lt.u32.totalorder %s652_s6, %s648_s3  ;;  %p656_p12 = scmp.lt.u32.totalorder %s648_s3, %s805_s26 }
 0x3e5   : > { %p650_p7 = pnand %p649_p4, %p754_p5 }
 0x3e6   : > { %p655_p11 = por %p654_p10, %p653_p9 }
 0x3e7   : > { %p651_p8 = pneg %p650_p7 }
 0x3e8   : > { %p657_p13 = por %p656_p12, %p655_p11 }
 0x3ea   : > { %p658_p0 = pnand %p657_p13, %p651_p8 }
 0x3ec   : > { %661 = shalt.err (!%p658_p0)
}
 0x3ed   : > { %583 = dma.vmem_to_hbm [thread:$0]  (%p754_p5), %s807_s23, 128, %s805_s26, %s433_s27   ;;  %v582_v47 = vpop.f32.mrb[11].mxu0 }
 0x3ee PF: > { %p589_p1 = scmp.ge.s32.totalorder %s696_s12, 2  ;;  %s458_s14 = sand.u32 1, %s684_s9  }
 0x3ef   : > { %s459_s16 = scalar_lea.sflag [#allocation3], %s458_s14 }
 0x3f0   : > { %p586_p2 = pnand %p589_p1, %p758_p6 }
 0x3f2   : > { %679 = dma.done.wait (!%p586_p2), %s459_s16, 128  }
 0x3f3   : > { %681 = vsyncadd (!%p586_p2), %s459_s16, 4294967168  ;;  %p12_p3 = scmp.ge.s32.totalorder %s741_s15, 4   ;;  %s853_s9 = smov %s688_s10 }
 0x3f4   : > { %s854_s10 = smov %s692_s11  ;;  %s855_s11 = smov %s752_s18 }
 0x3f5   : > { %s856_s12 = smov %s741_s15  ;;  %14 = sbr.rel (!%p12_p3) target bundleno = 3 (0x3), region = 65 }
 0x3fc   :  { %464 = vsyncpa [#allocation3], 1 }
 0x3fd   :  { %466 = vsyncpa [#allocation3 + $0x1], 1 }

</bundles_post_ra>
